<compile_context>
chip_gen: v7x
topology: tpu7x:2x2x1
jax: 0.10.0
libtpu: 0.0.40
codegen_flags: <defaults>
</compile_context>

<pallas_src>
import jax
import jax.numpy as jnp
from jax.experimental import pallas as pl
from jax.experimental.pallas import tpu as pltpu

IN_FEATURES = 3
OUT_FEATURES = 3

MAX_TILE_B = 4096  # lanes (batch rows) per grid step; multiple of 128


def _linear_kernel(w_ref, b_ref, xt_ref, ot_ref):
    # w_ref  : SMEM (OUT, IN)      nn.Linear weight (scalar reads)
    # b_ref  : SMEM (OUT,)         bias (scalar reads)
    # xt_ref : VMEM (IN, tile_b)   x^T block: features in sublanes, batch in lanes
    # ot_ref : VMEM (OUT, tile_b)  y^T block (lane-dense store)
    x = xt_ref[...]  # (IN_FEATURES, tile_b) f32
    for o in range(OUT_FEATURES):
        acc = w_ref[o, 0] * x[0:1, :]
        for k in range(1, IN_FEATURES):
            acc = acc + w_ref[o, k] * x[k:k + 1, :]
        ot_ref[pl.ds(o, 1), :] = acc + b_ref[o]


def linear_pallas(weight, bias, x):
    """nn.Linear(3, 3) forward.  weight: [out, in], bias: [out], x: [B, in]."""
    B = x.shape[0]

    # Batch tile (lane count per block).  Full batch when small (block last dim
    # equal to the array extent is always legal); otherwise 4096-lane tiles
    # (multiple of 128) with a partial trailing block handled by Pallas.
    tile_b = B if B <= MAX_TILE_B else MAX_TILE_B
    grid_b = pl.cdiv(B, tile_b)

    # Lane-dense layout for the kernel: batch in the lane axis.
    xt = x.astype(jnp.float32).T  # (IN_FEATURES, B)

    yt = pl.pallas_call(
        _linear_kernel,
        out_shape=jax.ShapeDtypeStruct((OUT_FEATURES, B), jnp.float32),
        grid=(grid_b,),
        in_specs=[
            pl.BlockSpec(memory_space=pltpu.MemorySpace.SMEM),  # weight (3, 3)
            pl.BlockSpec(memory_space=pltpu.MemorySpace.SMEM),  # bias (3,)
            pl.BlockSpec((IN_FEATURES, tile_b), lambda i: (0, i)),
        ],
        out_specs=pl.BlockSpec((OUT_FEATURES, tile_b), lambda i: (0, i)),
        compiler_params=pltpu.CompilerParams(
            dimension_semantics=("parallel",)),
    )(weight.astype(jnp.float32), bias.astype(jnp.float32), xt)

    return yt.T  # (B, OUT_FEATURES)


linear_forward = jax.jit(linear_pallas)


if __name__ == "__main__":
    key = jax.random.PRNGKey(0)
    k_x, k_w, k_b = jax.random.split(key, 3)

    # Deterministic parameter init (mimics nn.Linear uniform(-1/sqrt(in), 1/sqrt(in))).
    bound = 1.0 / jnp.sqrt(jnp.float32(IN_FEATURES))
    weight = jax.random.uniform(k_w, (OUT_FEATURES, IN_FEATURES), jnp.float32,
                                minval=-bound, maxval=bound)
    bias = jax.random.uniform(k_b, (OUT_FEATURES,), jnp.float32,
                              minval=-bound, maxval=bound)

    # Small example input: batch=8, features=3 (Linear(3, 3) input dim).
    x = jax.random.normal(k_x, (8, IN_FEATURES), jnp.float32)

    out = linear_forward(weight, bias, x)
    out = jax.block_until_ready(out)

    # Correctness check against plain JAX reference.
    ref = x @ weight.T + bias
    assert out.shape == (8, OUT_FEATURES)
    assert jnp.allclose(out, ref, atol=1e-5, rtol=1e-5)

    print("KERNEL_OK")
</pallas_src>

<mosaic_0001>
module attributes {stable_mosaic.version = 11 : i64} {
  func.func @_linear_kernel(%arg0: i32, %arg1: memref<3x3xf32, #tpu.memory_space<smem>>, %arg2: memref<3xf32, #tpu.memory_space<smem>>, %arg3: memref<3x8xf32, #tpu.memory_space<vmem>>, %arg4: memref<3x8xf32, #tpu.memory_space<vmem>>) attributes {dimension_semantics = [#tpu.dimension_semantics<parallel>], iteration_bounds = array<i64: 1>, scalar_prefetch = 0 : i64, scratch_operands = 0 : i64, tpu.core_type = #tpu.core_type<tc>, window_params = [{transform_indices = @transform_0, window_bounds = array<i64: 3, 3>}, {transform_indices = @transform_1, window_bounds = array<i64: 3>}, {transform_indices = @transform_2, window_bounds = array<i64: 3, 8>}, {transform_indices = @transform_3, window_bounds = array<i64: 3, 8>}]} {
    %c0 = arith.constant 0 : index
    %c0_0 = arith.constant 0 : index
    %0 = vector.load %arg3[%c0, %c0_0] : memref<3x8xf32, #tpu.memory_space<vmem>>, vector<3x8xf32>
    %c0_1 = arith.constant 0 : index
    %c0_2 = arith.constant 0 : index
    %1 = memref.load %arg1[%c0_1, %c0_2] : memref<3x3xf32, #tpu.memory_space<smem>>
    %2 = vector.extract_strided_slice %0 {offsets = [0, 0], sizes = [1, 8], strides = [1, 1]} : vector<3x8xf32> to vector<1x8xf32>
    %3 = vector.broadcast %1 : f32 to vector<1x8xf32>
    %4 = arith.mulf %3, %2 : vector<1x8xf32>
    %c0_3 = arith.constant 0 : index
    %c1 = arith.constant 1 : index
    %5 = memref.load %arg1[%c0_3, %c1] : memref<3x3xf32, #tpu.memory_space<smem>>
    %6 = vector.extract_strided_slice %0 {offsets = [1, 0], sizes = [1, 8], strides = [1, 1]} : vector<3x8xf32> to vector<1x8xf32>
    %7 = vector.broadcast %5 : f32 to vector<1x8xf32>
    %8 = arith.mulf %7, %6 : vector<1x8xf32>
    %9 = arith.addf %4, %8 : vector<1x8xf32>
    %c0_4 = arith.constant 0 : index
    %c2 = arith.constant 2 : index
    %10 = memref.load %arg1[%c0_4, %c2] : memref<3x3xf32, #tpu.memory_space<smem>>
    %11 = vector.extract_strided_slice %0 {offsets = [2, 0], sizes = [1, 8], strides = [1, 1]} : vector<3x8xf32> to vector<1x8xf32>
    %12 = vector.broadcast %10 : f32 to vector<1x8xf32>
    %13 = arith.mulf %12, %11 : vector<1x8xf32>
    %14 = arith.addf %9, %13 : vector<1x8xf32>
    %c0_5 = arith.constant 0 : index
    %15 = memref.load %arg2[%c0_5] : memref<3xf32, #tpu.memory_space<smem>>
    %16 = vector.broadcast %15 : f32 to vector<1x8xf32>
    %17 = arith.addf %14, %16 : vector<1x8xf32>
    %c0_6 = arith.constant 0 : index
    %c0_7 = arith.constant 0 : index
    %18 = vector.load %arg4[%c0_6, %c0_7] : memref<3x8xf32, #tpu.memory_space<vmem>>, vector<1x8xf32>
    tpu.vector_store %arg4[%c0_6, %c0_7], %17 {strides = array<i32>} : memref<3x8xf32, #tpu.memory_space<vmem>>, vector<1x8xf32>,
    %c1_8 = arith.constant 1 : index
    %c0_9 = arith.constant 0 : index
    %19 = memref.load %arg1[%c1_8, %c0_9] : memref<3x3xf32, #tpu.memory_space<smem>>
    %20 = vector.extract_strided_slice %0 {offsets = [0, 0], sizes = [1, 8], strides = [1, 1]} : vector<3x8xf32> to vector<1x8xf32>
    %21 = vector.broadcast %19 : f32 to vector<1x8xf32>
    %22 = arith.mulf %21, %20 : vector<1x8xf32>
    %c1_10 = arith.constant 1 : index
    %c1_11 = arith.constant 1 : index
    %23 = memref.load %arg1[%c1_10, %c1_11] : memref<3x3xf32, #tpu.memory_space<smem>>
    %24 = vector.extract_strided_slice %0 {offsets = [1, 0], sizes = [1, 8], strides = [1, 1]} : vector<3x8xf32> to vector<1x8xf32>
    %25 = vector.broadcast %23 : f32 to vector<1x8xf32>
    %26 = arith.mulf %25, %24 : vector<1x8xf32>
    %27 = arith.addf %22, %26 : vector<1x8xf32>
    %c1_12 = arith.constant 1 : index
    %c2_13 = arith.constant 2 : index
    %28 = memref.load %arg1[%c1_12, %c2_13] : memref<3x3xf32, #tpu.memory_space<smem>>
    %29 = vector.extract_strided_slice %0 {offsets = [2, 0], sizes = [1, 8], strides = [1, 1]} : vector<3x8xf32> to vector<1x8xf32>
    %30 = vector.broadcast %28 : f32 to vector<1x8xf32>
    %31 = arith.mulf %30, %29 : vector<1x8xf32>
    %32 = arith.addf %27, %31 : vector<1x8xf32>
    %c1_14 = arith.constant 1 : index
    %33 = memref.load %arg2[%c1_14] : memref<3xf32, #tpu.memory_space<smem>>
    %34 = vector.broadcast %33 : f32 to vector<1x8xf32>
    %35 = arith.addf %32, %34 : vector<1x8xf32>
    %c1_15 = arith.constant 1 : index
    %c0_16 = arith.constant 0 : index
    %36 = vector.load %arg4[%c1_15, %c0_16] : memref<3x8xf32, #tpu.memory_space<vmem>>, vector<1x8xf32>
    tpu.vector_store %arg4[%c1_15, %c0_16], %35 {strides = array<i32>} : memref<3x8xf32, #tpu.memory_space<vmem>>, vector<1x8xf32>,
    %c2_17 = arith.constant 2 : index
    %c0_18 = arith.constant 0 : index
    %37 = memref.load %arg1[%c2_17, %c0_18] : memref<3x3xf32, #tpu.memory_space<smem>>
    %38 = vector.extract_strided_slice %0 {offsets = [0, 0], sizes = [1, 8], strides = [1, 1]} : vector<3x8xf32> to vector<1x8xf32>
    %39 = vector.broadcast %37 : f32 to vector<1x8xf32>
    %40 = arith.mulf %39, %38 : vector<1x8xf32>
    %c2_19 = arith.constant 2 : index
    %c1_20 = arith.constant 1 : index
    %41 = memref.load %arg1[%c2_19, %c1_20] : memref<3x3xf32, #tpu.memory_space<smem>>
    %42 = vector.extract_strided_slice %0 {offsets = [1, 0], sizes = [1, 8], strides = [1, 1]} : vector<3x8xf32> to vector<1x8xf32>
    %43 = vector.broadcast %41 : f32 to vector<1x8xf32>
    %44 = arith.mulf %43, %42 : vector<1x8xf32>
    %45 = arith.addf %40, %44 : vector<1x8xf32>
    %c2_21 = arith.constant 2 : index
    %c2_22 = arith.constant 2 : index
    %46 = memref.load %arg1[%c2_21, %c2_22] : memref<3x3xf32, #tpu.memory_space<smem>>
    %47 = vector.extract_strided_slice %0 {offsets = [2, 0], sizes = [1, 8], strides = [1, 1]} : vector<3x8xf32> to vector<1x8xf32>
    %48 = vector.broadcast %46 : f32 to vector<1x8xf32>
    %49 = arith.mulf %48, %47 : vector<1x8xf32>
    %50 = arith.addf %45, %49 : vector<1x8xf32>
    %c2_23 = arith.constant 2 : index
    %51 = memref.load %arg2[%c2_23] : memref<3xf32, #tpu.memory_space<smem>>
    %52 = vector.broadcast %51 : f32 to vector<1x8xf32>
    %53 = arith.addf %50, %52 : vector<1x8xf32>
    %c2_24 = arith.constant 2 : index
    %c0_25 = arith.constant 0 : index
    %54 = vector.load %arg4[%c2_24, %c0_25] : memref<3x8xf32, #tpu.memory_space<vmem>>, vector<1x8xf32>
    tpu.vector_store %arg4[%c2_24, %c0_25], %53 {strides = array<i32>} : memref<3x8xf32, #tpu.memory_space<vmem>>, vector<1x8xf32>,
    return
  }
  func.func @transform_0(%arg0: i32) -> (i32, i32) {
    %c0_i32 = arith.constant 0 : i32
    %c0_i32_0 = arith.constant 0 : i32
    %c0_i32_1 = arith.constant 0 : i32
    return %c0_i32, %c0_i32_0 : i32, i32
  }
  func.func @transform_1(%arg0: i32) -> i32 {
    %c0_i32 = arith.constant 0 : i32
    %c0_i32_0 = arith.constant 0 : i32
    return %c0_i32 : i32
  }
  func.func @transform_2(%arg0: i32) -> (i32, i32) {
    %c0_i32 = arith.constant 0 : i32
    %c0_i32_0 = arith.constant 0 : i32
    return %c0_i32, %arg0 : i32, i32
  }
  func.func @transform_3(%arg0: i32) -> (i32, i32) {
    %c0_i32 = arith.constant 0 : i32
    %c0_i32_0 = arith.constant 0 : i32
    return %c0_i32, %arg0 : i32, i32
  }
}

</mosaic_0001>

<bundles_post_ra>
// kernel: linear_pallas.1
= control target key start
LH: loop header
LB: loop body
LE: loop exit
PB: predicated region body
PF: predicated region fallthrough
CT: control target
= control target key end

     0   :  { %8 = vsyncpa [#allocation4], 0  ;;  %s244_s0 = inlined_call_operand.hbm [shape: f32[3,3], index: 0, kind: input, shape index: {}]   ;;  %s245_s1 = inlined_call_operand.vmem [shape: f32[3], index: 1, kind: input, shape index: {}]   ;;  %s246_s2 = inlined_call_operand.vmem [shape: f32[3,8], index: 2, kind: input, shape index: {}]   ;;  %s247_s3 = inlined_call_operand.hbm [shape: f32[3,8], index: 3, kind: output, shape index: {}]  }
   0x1   :  { %9 = vsyncpa [#allocation5], 0 }
   0x2   :  { %10 = vsyncpa [#allocation3], 0  ;;  %s25_s14 = sshll.u32 %s245_s1, 4  ;;  %s132_s17 = scalar_lea.hbm %s244_s0, 64  ;;  %s26_s14 = int_to_ptr.vmem [resolvable:$true] %s25_s14 }
   0x3   :  { %p133_p0 = scmp.ne.s32.totalorder %s244_s0, %s132_s17  ;;  %p136_p1 = scmp.lt.u32.totalorder %s132_s17, %s244_s0 }
   0x5   :  { %p138_p2 = pnand %p136_p1, %p133_p0 }
   0x7   :  { %141 = shalt.err (!%p138_p2)
}
   0x8   :  { %s182_s22 = smov [#allocation2]   ;;  %s142_s1 = scalar_lea.vmem %s26_s14, 16 }
   0x9   :  { %18 = dma.hbm_to_smem %s244_s0, 64, %s182_s22, [#allocation4]  }
   0xa   :  { %p143_p3 = scmp.ne.s32.totalorder %s26_s14, %s142_s1  ;;  %p147_p4 = scmp.lt.s32.totalorder %s26_s14, %s26_s14 }
   0xb   :  { %p148_p5 = scmp.lt.s32.totalorder %s142_s1, %s142_s1 }
   0xd   :  { %p149_p6 = por %p148_p5, %p147_p4 }
   0xf   :  { %p150_p7 = pnand %p149_p6, %p143_p3 }
  0x11   :  { %153 = shalt.err (!%p150_p7)
}
  0x12   :  { %s183_s25 = smov [#allocation6]  }
  0x13   :  { %28 = dma.vmem_to_smem %s26_s14, 16, %s183_s25, [#allocation5]  }
  0x14   :  { %176 = dma.done.wait [#allocation4], 64  }
  0x15   :  { %177 = vsyncadd [#allocation4], 4294967232 }
  0x16   :  { %178 = dma.done.wait [#allocation5], 16  }
  0x17   :  { %179 = vsyncadd [#allocation5], 4294967280 }
  0x18   :  { %37 = sfence }
  0x19   :  { %s39_s26 = sld [smem:[#allocation2]]  ;;  %s119_s27 = sld [smem:[#allocation2 + $0x1]]  ;;  %v38_v0 = vld [vmem:[%s246_s2] sm:$0x7]  ;;  %vm59_vm0 = vcmask 57344  }
  0x1a   :  { %s120_s28 = sld [smem:[#allocation2 + $0x2]]  ;;  %s121_s29 = sld [smem:[#allocation2 + $0x80]] }
  0x1b   :  { %s122_s0 = sld [smem:[#allocation2 + $0x81]]  ;;  %s220_s30 = sld [smem:[#allocation6]] }
  0x1c   :  { %s123_s4 = sld [smem:[#allocation2 + $0x82]]  ;;  %s125_s7 = sld [smem:[#allocation2 + $0x100]] }
  0x1d   :  { %s126_s8 = sld [smem:[#allocation2 + $0x101]]  ;;  %s127_s9 = sld [smem:[#allocation2 + $0x102]] }
  0x1e   :  { %s225_s10 = sld [smem:[#allocation6 + $0x1]]  ;;  %s128_s11 = sld [smem:[#allocation6 + $0x2]] }
  0x1f   :  { %v40_v1 = vstv %s39_s26  ;;  %v43_v2 = vstv %s119_s27  ;;  %s184_s2 = smov [#allocation7]  }
  0x20   :  { %v41_v3 = vmul.f32 %v40_v1, %v38_v0  ;;  %v44_v4 = vmul.f32 %v43_v2, %v38_v0  ;;  %v50_v5 = vstv %s120_s28  ;;  %v62_v7 = vstv %s121_s29  ;;  %s109_s12 = sshll.u32 %s184_s2, 4  ;;  %s110_s12 = int_to_ptr.vmem [resolvable:$true] %s109_s12 }
  0x21   :  { %v51_v6 = vmul.f32 %v50_v5, %v38_v0  ;;  %v65_v8 = vstv %s122_s0  ;;  %v63_v10 = vmul.f32 %v62_v7, %v38_v0  ;;  %v57_v17 = vstv %s220_s30  ;;  %s154_s13 = scalar_lea.vmem %s110_s12, 64  ;;  %p159_p9 = scmp.lt.s32.totalorder %s110_s12, %s110_s12 }
  0x22   :  { %v46_v9 = vrot.slane %v44_v4, 1  ;;  %v66_v11 = vmul.f32 %v65_v8, %v38_v0  ;;  %v72_v12 = vstv %s123_s4  ;;  %v83_v15 = vstv %s125_s7  ;;  %p155_p8 = scmp.ne.s32.totalorder %s110_s12, %s154_s13  ;;  %p160_p10 = scmp.lt.s32.totalorder %s154_s13, %s154_s13 }
  0x23   :  { %v53_v13 = vrot.slane %v51_v6, 2  ;;  %v73_v14 = vmul.f32 %v72_v12, %v38_v0  ;;  %v86_v19 = vstv %s126_s8  ;;  %v84_v21 = vmul.f32 %v83_v15, %v38_v0 }
  0x24   :  { %v48_v16 = vadd.f32 %v46_v9, %v41_v3  ;;  %v68_v18 = vrot.slane %v66_v11, 1  ;;  %v87_v22 = vmul.f32 %v86_v19, %v38_v0  ;;  %v93_v23 = vstv %s127_s9  ;;  %p161_p11 = por %p160_p10, %p159_p9 }
  0x25   :  { %v75_v20 = vrot.slane %v73_v14, 2  ;;  %v94_v26 = vmul.f32 %v93_v23, %v38_v0  ;;  %v79_v27 = vstv %s225_s10  ;;  %v100_v34 = vstv %s128_s11 }
  0x26   :  { %v55_v24 = vadd.f32 %v53_v13, %v48_v16  ;;  %v70_v25 = vadd.f32 %v68_v18, %v63_v10  ;;  %v89_v28 = vrot.slane %v87_v22, 1  ;;  %p162_p12 = pnand %p161_p11, %p155_p8 }
  0x27   :  { %v96_v31 = vrot.slane %v94_v26, 2 }
  0x28   :  { %v58_v29 = vadd.f32 %v57_v17, %v55_v24  ;;  %v77_v30 = vadd.f32 %v75_v20, %v70_v25  ;;  %v91_v32 = vadd.f32 %v89_v28, %v84_v21 }
  0x2a   :  { %60 = vst.msk [vmem:[#allocation7] sm:$0x1] %vm59_vm0, %v58_v29  ;;  %v80_v33 = vadd.f32 %v79_v27, %v77_v30  ;;  %v98_v35 = vadd.f32 %v96_v31, %v91_v32 }
  0x2c   :  { %81 = vst.msk [vmem:[#allocation7 + $0x1] sm:$0x1] %vm59_vm0, %v80_v33  ;;  %v101_v36 = vadd.f32 %v100_v34, %v98_v35 }
  0x2e   :  { %102 = vst.msk [vmem:[#allocation7 + $0x2] sm:$0x1] %vm59_vm0, %v101_v36 }
  0x2f   :  { %165 = shalt.err (!%p162_p12)
}
  0x30   :  { %s166_s16 = scalar_lea.hbm %s247_s3, 64 }
  0x31   :  { %p167_p13 = scmp.ne.s32.totalorder %s247_s3, %s166_s16  ;;  %p170_p0 = scmp.lt.u32.totalorder %s166_s16, %s247_s3 }
  0x33   :  { %p172_p1 = pnand %p170_p0, %p167_p13 }
  0x35   :  { %175 = shalt.err (!%p172_p1)
}
  0x36   :  { %112 = dma.vmem_to_hbm [thread:$0]  %s110_s12, 64, %s247_s3, [#allocation3]  }
  0x37   :  { %180 = dma.done.wait [#allocation3], 64  }
  0x38   :  { %181 = vsyncadd [#allocation3], 4294967232 }
  0x39   :  { %116 = vsyncpa [#allocation3], 1 }
  0x3a   :  { %117 = vsyncpa [#allocation4], 1 }
  0x3b   :  { %118 = vsyncpa [#allocation5], 1 }

</bundles_post_ra>
